<compile_context>
chip_gen: v5e
topology: v5e:2x2
jax: 0.10.0
libtpu: 0.0.40
codegen_flags: <defaults>
</compile_context>

<pallas_src>
import functools

import jax
import jax.numpy as jnp
from jax import lax
from jax.experimental import pallas as pl
from jax.experimental.pallas import tpu as pltpu

EPS = 1e-5


def _round_up(v, m):
    return ((v + m - 1) // m) * m


def _pick_vmem_limit():
    # ~75% of physical VMEM, capped at 96 MiB: ~96 MiB on v5e/v6e (128 MiB
    # physical), ~48 MiB on v7x (64 MiB physical). Conservative fallback.
    try:
        info = pltpu.get_tpu_info()
        cap = getattr(info, "vmem_capacity_bytes", None)
        if cap:
            return int(min(96 * 2**20, (cap * 3) // 4))
    except Exception:
        pass
    return 32 * 2**20


_VMEM_LIMIT = _pick_vmem_limit()


# -----------------------------------------------------------------------------
# Pass 1: fused (im2col-free) convolution + BN partial statistics.
#   grid = (batch, flat-spatial tile);  stats accumulate over the tile axis.
# -----------------------------------------------------------------------------
def _conv_stats_kernel(x_ref, w_ref, mask_ref, conv_ref, stats_ref, patch_ref,
                       *, taps, c, l_tile):
    """
    x_ref    : (1, 1, n_phase*C, L_WIN)  bf16  windowed, phase-decimated input
    w_ref    : (OC_pad, KH*KW*C)         bf16  weight matrix
    mask_ref : (1, L_TILE)               f32   1.0 on valid flat columns
    conv_ref : (1, OC_pad, L_TILE)       bf16  conv output tile (lane-dense)
    stats_ref: (1, OC_pad, 2)            f32   per-image [sum, sum_sq] accumulator
    patch_ref: (KH*KW*C, L_TILE)         bf16  scratch: gathered tap windows
    """
    # Gather the KH*KW tap windows (all-static slices) into one contiguous
    # operand -- replaces the old per-tap dot chain.
    for t, (row0, off) in enumerate(taps):
        patch_ref[t * c:(t + 1) * c, :] = x_ref[0, 0, row0:row0 + c,
                                                off:off + l_tile]

    # One MXU contraction with K = KH*KW*C, f32 accumulation inside the MXU.
    acc = jnp.dot(w_ref[...], patch_ref[...],
                  preferred_element_type=jnp.float32)      # (OC_pad, L_TILE)
    conv_ref[0] = acc.astype(conv_ref.dtype)

    # BN partial statistics from the f32 accumulator (junk columns masked).
    masked = acc * mask_ref[...]
    s1 = jnp.sum(masked, axis=1, keepdims=True)            # (OC_pad, 1)
    s2 = jnp.sum(masked * acc, axis=1, keepdims=True)      # (OC_pad, 1)

    @pl.when(pl.program_id(1) == 0)
    def _():
        stats_ref[...] = jnp.zeros_like(stats_ref)

    stats_ref[0] += jnp.concatenate([s1, s2], axis=1)      # (OC_pad, 2)


# -----------------------------------------------------------------------------
# Pass 2: y = conv * scale + shift, lane-dense flat output (unmasked stores).
# -----------------------------------------------------------------------------
def _bn_apply_kernel(conv_ref, scale_ref, shift_ref, out_ref):
    out_ref[0] = (conv_ref[0].astype(jnp.float32) * scale_ref[...]
                  + shift_ref[...])


# -----------------------------------------------------------------------------
# Wrapper
# -----------------------------------------------------------------------------
@functools.partial(jax.jit, static_argnames=("stride", "padding", "dilation",
                                             "groups", "l_tile"))
def conv2d_bn_forward(x, weight, gamma, beta, *,
                      stride=1, padding=0, dilation=1, groups=1, l_tile=2048):
    """x: (N, C, H, W) f32, weight: (OC, C, KH, KW) f32 -> (N, OC, OH, OW) f32."""
    if groups != 1:
        # TODO(synk): grouped convolution not supported by the fused kernel.
        raise NotImplementedError("groups != 1 is not supported")

    n, c, h, w = x.shape
    oc, _, kh, kw = weight.shape
    s, p, d = stride, padding, dilation
    oh = (h + 2 * p - d * (kh - 1) - 1) // s + 1
    ow = (w + 2 * p - d * (kw - 1) - 1) // s + 1
    hp, wp = h + 2 * p, w + 2 * p
    hs, ws = -(-hp // s), -(-wp // s)          # per-phase extents (ceil-div)
    ls = hs * ws

    oc_pad = _round_up(oc, 8)                  # f32 sublane multiple
    k_dim = kh * kw * c                        # single-contraction depth
    n_ph = s * s

    # Flat-spatial tiling (lane-dense, 128-multiples).
    l_needed = oh * ws                         # flat cols covering all output rows
    l128 = _round_up(l_needed, 128)
    l_tile_eff = min(_round_up(max(l_tile, 128), 128), l128)
    l_total = _round_up(l128, l_tile_eff)
    n_lt = l_total // l_tile_eff

    # Static (merged-phase row offset, flat lane offset) per tap.
    taps = []
    for i in range(kh):
        for j in range(kw):
            ph_r, a = (d * i) % s, (d * i) // s
            ph_c, b = (d * j) % s, (d * j) // s
            taps.append(((ph_r * s + ph_c) * c, a * ws + b))
    max_off = max(off for _, off in taps)
    halo = _round_up(max_off, 128) if max_off > 0 else 0
    l_win = l_tile_eff + halo                  # per-tile input window (with halo)

    # ---- plain-JAX prep: bf16 cast FIRST, then pad + phase decimation + windows
    x16 = x.astype(jnp.bfloat16)
    xp = jnp.pad(x16, ((0, 0), (0, 0), (p, p), (p, p)))
    planes = []
    for ph in range(s):
        for pw in range(s):
            plane = xp[:, :, ph::s, pw::s]
            plane = jnp.pad(plane, ((0, 0), (0, 0),
                                    (0, hs - plane.shape[2]),
                                    (0, ws - plane.shape[3])))
            planes.append(plane.reshape(n, c, ls))
    x_flat = jnp.concatenate(planes, axis=1) if len(planes) > 1 else planes[0]
    flat_len = max(ls, (n_lt - 1) * l_tile_eff + l_win)
    x_flat = jnp.pad(x_flat, ((0, 0), (0, 0), (0, flat_len - ls)))
    x_win = jnp.stack(
        [lax.slice_in_dim(x_flat, lt * l_tile_eff, lt * l_tile_eff + l_win,
                          axis=2) for lt in range(n_lt)],
        axis=1)                                 # (n, n_lt, n_ph*c, l_win)

    # Weight matrix (OC_pad, KH*KW*C): rows grouped per tap, channel-minor --
    # must match the patch gather order in the kernel.
    w_mat = weight.transpose(0, 2, 3, 1).reshape(oc, k_dim)
    w_mat = jnp.pad(w_mat, ((0, oc_pad - oc), (0, 0))).astype(jnp.bfloat16)

    # Validity mask for the flat columns (row-gap junk + lane padding).
    cols = jnp.arange(l_total)
    valid = ((cols < l_needed) & ((cols % ws) < ow)).astype(jnp.float32)
    valid = valid.reshape(1, l_total)

    nphc = n_ph * c

    # ---- pass 1: conv + BN partial stats --------------------------------------
    flops1 = 2 * n * oc_pad * k_dim * l_total
    bytes1 = (n * n_lt * nphc * l_win * 2 + oc_pad * k_dim * 2 + l_total * 4
              + n * oc_pad * l_total * 2 + n * oc_pad * 2 * 4)
    conv_flat, stats = pl.pallas_call(
        functools.partial(_conv_stats_kernel, taps=tuple(taps), c=c,
                          l_tile=l_tile_eff),
        out_shape=(jax.ShapeDtypeStruct((n, oc_pad, l_total), jnp.bfloat16),
                   jax.ShapeDtypeStruct((n, oc_pad, 2), jnp.float32)),
        grid=(n, n_lt),
        in_specs=[pl.BlockSpec((1, 1, nphc, l_win), lambda b, lt: (b, lt, 0, 0)),
                  pl.BlockSpec((oc_pad, k_dim), lambda b, lt: (0, 0)),
                  pl.BlockSpec((1, l_tile_eff), lambda b, lt: (0, lt))],
        out_specs=(pl.BlockSpec((1, oc_pad, l_tile_eff), lambda b, lt: (b, 0, lt)),
                   pl.BlockSpec((1, oc_pad, 2), lambda b, lt: (b, 0, 0))),
        scratch_shapes=[pltpu.VMEM((k_dim, l_tile_eff), jnp.bfloat16)],
        compiler_params=pltpu.CompilerParams(
            dimension_semantics=("parallel", "arbitrary"),
            vmem_limit_bytes=_VMEM_LIMIT),
        cost_estimate=pl.CostEstimate(flops=flops1, transcendentals=0,
                                      bytes_accessed=bytes1),
    )(x_win, w_mat, valid)

    # ---- tiny per-channel reduction (Chan combine of per-image mean/M2) --------
    m = float(oh * ow)                          # valid elements per image
    sum_i = stats[:, :oc, 0]                    # (n, oc)
    sumsq_i = stats[:, :oc, 1]
    mean_i = sum_i / m
    m2_i = jnp.maximum(sumsq_i - sum_i * mean_i, 0.0)
    mean = jnp.mean(mean_i, axis=0)
    m2 = jnp.sum(m2_i, axis=0) + m * jnp.sum((mean_i - mean[None, :]) ** 2, axis=0)
    var = jnp.maximum(m2 / (n * m), 0.0)        # biased variance (training mode)
    inv = lax.rsqrt(var + EPS)
    scale_c = gamma * inv
    shift_c = beta - mean * scale_c
    scale = jnp.pad(scale_c.reshape(oc, 1),
                    ((0, oc_pad - oc), (0, 0))).astype(jnp.float32)
    shift = jnp.pad(shift_c.reshape(oc, 1),
                    ((0, oc_pad - oc), (0, 0))).astype(jnp.float32)

    # ---- pass 2: BN apply, lane-dense flat output -------------------------------
    flops2 = 2 * n * oc_pad * l_total
    bytes2 = n * oc_pad * l_total * (2 + 4) + oc_pad * 2 * 4
    out_flat = pl.pallas_call(
        _bn_apply_kernel,
        out_shape=jax.ShapeDtypeStruct((n, oc_pad, l_total), jnp.float32),
        grid=(n, n_lt),
        in_specs=[pl.BlockSpec((1, oc_pad, l_tile_eff), lambda b, lt: (b, 0, lt)),
                  pl.BlockSpec((oc_pad, 1), lambda b, lt: (0, 0)),
                  pl.BlockSpec((oc_pad, 1), lambda b, lt: (0, 0))],
        out_specs=pl.BlockSpec((1, oc_pad, l_tile_eff), lambda b, lt: (b, 0, lt)),
        compiler_params=pltpu.CompilerParams(
            dimension_semantics=("parallel", "parallel"),
            vmem_limit_bytes=_VMEM_LIMIT),
        cost_estimate=pl.CostEstimate(flops=flops2, transcendentals=0,
                                      bytes_accessed=bytes2),
    )(conv_flat, scale, shift)

    # Final NCHW emission: wrapper-side layout plumbing (one fused XLA copy);
    # keeps the Pallas stores unmasked / 128-multiple lane-dense.
    out = out_flat[:, :oc, :oh * ws].reshape(n, oc, oh, ws)[:, :, :, :ow]
    return out


# -----------------------------------------------------------------------------
# Reference (plain JAX, bf16 conv operands / f32 accumulation, f32 BN)
# -----------------------------------------------------------------------------
def _reference(x, weight, gamma, beta, stride, padding, dilation):
    conv = lax.conv_general_dilated(
        x.astype(jnp.bfloat16), weight.astype(jnp.bfloat16),
        window_strides=(stride, stride),
        padding=((padding, padding), (padding, padding)),
        rhs_dilation=(dilation, dilation),
        dimension_numbers=("NCHW", "OIHW", "NCHW"),
        preferred_element_type=jnp.float32,
    )
    mean = conv.mean(axis=(0, 2, 3), keepdims=True)
    var = ((conv - mean) ** 2).mean(axis=(0, 2, 3), keepdims=True)
    g = gamma.reshape(1, -1, 1, 1)
    b = beta.reshape(1, -1, 1, 1)
    return (conv - mean) * lax.rsqrt(var + EPS) * g + b


if __name__ == "__main__":
    key = jax.random.PRNGKey(0)
    kx, kw_, kg, kb = jax.random.split(key, 4)

    # Conv2dBN(in_channels=4, out_channels=8, kernel_size=3, padding=1)
    N, C, H, W = 2, 4, 16, 16
    OC, KH, KW = 8, 3, 3
    x = jax.random.normal(kx, (N, C, H, W), dtype=jnp.float32)
    weight = jax.random.normal(kw_, (OC, C, KH, KW), dtype=jnp.float32) * 0.1
    gamma = 1.0 + 0.1 * jax.random.normal(kg, (OC,), dtype=jnp.float32)
    beta = 0.1 * jax.random.normal(kb, (OC,), dtype=jnp.float32)

    # Tolerance reflects the bf16 conv intermediate (<= 2^-9 relative rounding
    # on the pre-normalization activations); real bugs produce O(1) errors.
    TOL = 1e-2

    # (stride, padding, dilation, l_tile): default path, stride-2 phase path,
    # and a forced multi-tile path (exercises the cross-tile stats accumulator).
    for (s, p, d, lt) in [(1, 1, 1, 2048), (2, 1, 1, 2048), (1, 1, 1, 128)]:
        out = conv2d_bn_forward(x, weight, gamma, beta,
                                stride=s, padding=p, dilation=d, l_tile=lt)
        out = jax.block_until_ready(out)
        ref = _reference(x, weight, gamma, beta, s, p, d)
        assert out.shape == ref.shape, (out.shape, ref.shape)
        max_err = float(jnp.max(jnp.abs(out - ref)))
        assert jnp.allclose(out, ref, rtol=TOL, atol=TOL), (s, p, d, lt, max_err)

    print("KERNEL_OK")
</pallas_src>

<mosaic_0001>
module attributes {stable_mosaic.version = 11 : i64} {
  func.func @_conv_stats_kernel(%arg0: i32, %arg1: i32, %arg2: memref<1x1x4x512xbf16, #tpu.memory_space<vmem>>, %arg3: memref<8x36xbf16, #tpu.memory_space<vmem>>, %arg4: memref<1x384xf32, #tpu.memory_space<vmem>>, %arg5: memref<1x8x384xbf16, #tpu.memory_space<vmem>>, %arg6: memref<1x8x2xf32, #tpu.memory_space<vmem>>, %arg7: memref<36x384xbf16, #tpu.memory_space<vmem>>) attributes {dimension_semantics = [#tpu.dimension_semantics<parallel>, #tpu.dimension_semantics<arbitrary>], iteration_bounds = array<i64: 2, 1>, scalar_prefetch = 0 : i64, scratch_operands = 1 : i64, tpu.core_type = #tpu.core_type<tc>, window_params = [{transform_indices = @transform_0, window_bounds = array<i64: 1, 1, 4, 512>}, {pipeline_mode = #tpu.pipeline_mode<synchronous>, transform_indices = @transform_1, window_bounds = array<i64: 8, 36>}, {transform_indices = @transform_2, window_bounds = array<i64: 1, 384>}, {transform_indices = @transform_3, window_bounds = array<i64: 1, 8, 384>}, {transform_indices = @transform_4, window_bounds = array<i64: 1, 8, 2>}]} {
    %c0 = arith.constant 0 : index
    %c0_0 = arith.constant 0 : index
    %c0_1 = arith.constant 0 : index
    %c0_2 = arith.constant 0 : index
    %0 = vector.load %arg2[%c0, %c0_0, %c0_1, %c0_2] : memref<1x1x4x512xbf16, #tpu.memory_space<vmem>>, vector<1x1x4x384xbf16>
    %1 = vector.shape_cast %0 : vector<1x1x4x384xbf16> to vector<4x384xbf16>
    %c0_3 = arith.constant 0 : index
    %c0_4 = arith.constant 0 : index
    %2 = vector.load %arg7[%c0_3, %c0_4] : memref<36x384xbf16, #tpu.memory_space<vmem>>, vector<4x384xbf16>
    tpu.vector_store %arg7[%c0_3, %c0_4], %1 {strides = array<i32>} : memref<36x384xbf16, #tpu.memory_space<vmem>>, vector<4x384xbf16>,
    %c0_5 = arith.constant 0 : index
    %c0_6 = arith.constant 0 : index
    %c0_7 = arith.constant 0 : index
    %c1 = arith.constant 1 : index
    %3 = vector.load %arg2[%c0_5, %c0_6, %c0_7, %c1] : memref<1x1x4x512xbf16, #tpu.memory_space<vmem>>, vector<1x1x4x384xbf16>
    %4 = vector.shape_cast %3 : vector<1x1x4x384xbf16> to vector<4x384xbf16>
    %c4 = arith.constant 4 : index
    %c0_8 = arith.constant 0 : index
    %5 = vector.load %arg7[%c4, %c0_8] : memref<36x384xbf16, #tpu.memory_space<vmem>>, vector<4x384xbf16>
    tpu.vector_store %arg7[%c4, %c0_8], %4 {strides = array<i32>} : memref<36x384xbf16, #tpu.memory_space<vmem>>, vector<4x384xbf16>,
    %c0_9 = arith.constant 0 : index
    %c0_10 = arith.constant 0 : index
    %c0_11 = arith.constant 0 : index
    %c2 = arith.constant 2 : index
    %6 = vector.load %arg2[%c0_9, %c0_10, %c0_11, %c2] : memref<1x1x4x512xbf16, #tpu.memory_space<vmem>>, vector<1x1x4x384xbf16>
    %7 = vector.shape_cast %6 : vector<1x1x4x384xbf16> to vector<4x384xbf16>
    %c8 = arith.constant 8 : index
    %c0_12 = arith.constant 0 : index
    %8 = vector.load %arg7[%c8, %c0_12] : memref<36x384xbf16, #tpu.memory_space<vmem>>, vector<4x384xbf16>
    tpu.vector_store %arg7[%c8, %c0_12], %7 {strides = array<i32>} : memref<36x384xbf16, #tpu.memory_space<vmem>>, vector<4x384xbf16>,
    %c0_13 = arith.constant 0 : index
    %c0_14 = arith.constant 0 : index
    %c0_15 = arith.constant 0 : index
    %c18 = arith.constant 18 : index
    %9 = vector.load %arg2[%c0_13, %c0_14, %c0_15, %c18] : memref<1x1x4x512xbf16, #tpu.memory_space<vmem>>, vector<1x1x4x384xbf16>
    %10 = vector.shape_cast %9 : vector<1x1x4x384xbf16> to vector<4x384xbf16>
    %c12 = arith.constant 12 : index
    %c0_16 = arith.constant 0 : index
    %11 = vector.load %arg7[%c12, %c0_16] : memref<36x384xbf16, #tpu.memory_space<vmem>>, vector<4x384xbf16>
    tpu.vector_store %arg7[%c12, %c0_16], %10 {strides = array<i32>} : memref<36x384xbf16, #tpu.memory_space<vmem>>, vector<4x384xbf16>,
    %c0_17 = arith.constant 0 : index
    %c0_18 = arith.constant 0 : index
    %c0_19 = arith.constant 0 : index
    %c19 = arith.constant 19 : index
    %12 = vector.load %arg2[%c0_17, %c0_18, %c0_19, %c19] : memref<1x1x4x512xbf16, #tpu.memory_space<vmem>>, vector<1x1x4x384xbf16>
    %13 = vector.shape_cast %12 : vector<1x1x4x384xbf16> to vector<4x384xbf16>
    %c16 = arith.constant 16 : index
    %c0_20 = arith.constant 0 : index
    %14 = vector.load %arg7[%c16, %c0_20] : memref<36x384xbf16, #tpu.memory_space<vmem>>, vector<4x384xbf16>
    tpu.vector_store %arg7[%c16, %c0_20], %13 {strides = array<i32>} : memref<36x384xbf16, #tpu.memory_space<vmem>>, vector<4x384xbf16>,
    %c0_21 = arith.constant 0 : index
    %c0_22 = arith.constant 0 : index
    %c0_23 = arith.constant 0 : index
    %c20 = arith.constant 20 : index
    %15 = vector.load %arg2[%c0_21, %c0_22, %c0_23, %c20] : memref<1x1x4x512xbf16, #tpu.memory_space<vmem>>, vector<1x1x4x384xbf16>
    %16 = vector.shape_cast %15 : vector<1x1x4x384xbf16> to vector<4x384xbf16>
    %c20_24 = arith.constant 20 : index
    %c0_25 = arith.constant 0 : index
    %17 = vector.load %arg7[%c20_24, %c0_25] : memref<36x384xbf16, #tpu.memory_space<vmem>>, vector<4x384xbf16>
    tpu.vector_store %arg7[%c20_24, %c0_25], %16 {strides = array<i32>} : memref<36x384xbf16, #tpu.memory_space<vmem>>, vector<4x384xbf16>,
    %c0_26 = arith.constant 0 : index
    %c0_27 = arith.constant 0 : index
    %c0_28 = arith.constant 0 : index
    %c36 = arith.constant 36 : index
    %18 = vector.load %arg2[%c0_26, %c0_27, %c0_28, %c36] : memref<1x1x4x512xbf16, #tpu.memory_space<vmem>>, vector<1x1x4x384xbf16>
    %19 = vector.shape_cast %18 : vector<1x1x4x384xbf16> to vector<4x384xbf16>
    %c24 = arith.constant 24 : index
    %c0_29 = arith.constant 0 : index
    %20 = vector.load %arg7[%c24, %c0_29] : memref<36x384xbf16, #tpu.memory_space<vmem>>, vector<4x384xbf16>
    tpu.vector_store %arg7[%c24, %c0_29], %19 {strides = array<i32>} : memref<36x384xbf16, #tpu.memory_space<vmem>>, vector<4x384xbf16>,
    %c0_30 = arith.constant 0 : index
    %c0_31 = arith.constant 0 : index
    %c0_32 = arith.constant 0 : index
    %c37 = arith.constant 37 : index
    %21 = vector.load %arg2[%c0_30, %c0_31, %c0_32, %c37] : memref<1x1x4x512xbf16, #tpu.memory_space<vmem>>, vector<1x1x4x384xbf16>
    %22 = vector.shape_cast %21 : vector<1x1x4x384xbf16> to vector<4x384xbf16>
    %c28 = arith.constant 28 : index
    %c0_33 = arith.constant 0 : index
    %23 = vector.load %arg7[%c28, %c0_33] : memref<36x384xbf16, #tpu.memory_space<vmem>>, vector<4x384xbf16>
    tpu.vector_store %arg7[%c28, %c0_33], %22 {strides = array<i32>} : memref<36x384xbf16, #tpu.memory_space<vmem>>, vector<4x384xbf16>,
    %c0_34 = arith.constant 0 : index
    %c0_35 = arith.constant 0 : index
    %c0_36 = arith.constant 0 : index
    %c38 = arith.constant 38 : index
    %24 = vector.load %arg2[%c0_34, %c0_35, %c0_36, %c38] : memref<1x1x4x512xbf16, #tpu.memory_space<vmem>>, vector<1x1x4x384xbf16>
    %25 = vector.shape_cast %24 : vector<1x1x4x384xbf16> to vector<4x384xbf16>
    %c32 = arith.constant 32 : index
    %c0_37 = arith.constant 0 : index
    %26 = vector.load %arg7[%c32, %c0_37] : memref<36x384xbf16, #tpu.memory_space<vmem>>, vector<4x384xbf16>
    tpu.vector_store %arg7[%c32, %c0_37], %25 {strides = array<i32>} : memref<36x384xbf16, #tpu.memory_space<vmem>>, vector<4x384xbf16>,
    %c0_38 = arith.constant 0 : index
    %c0_39 = arith.constant 0 : index
    %27 = vector.load %arg3[%c0_38, %c0_39] : memref<8x36xbf16, #tpu.memory_space<vmem>>, vector<8x36xbf16>
    %c0_40 = arith.constant 0 : index
    %c0_41 = arith.constant 0 : index
    %28 = vector.load %arg7[%c0_40, %c0_41] : memref<36x384xbf16, #tpu.memory_space<vmem>>, vector<36x384xbf16>
    %cst = arith.constant dense<0.000000e+00> : vector<8x384xf32>
    %29 = tpu.matmul %27, %28, %cst {dimension_numbers = #tpu.dot_dimension_numbers<[1], [0], [0], [1], [0, 0, 1, 1], [], []>} : vector<8x36xbf16>, vector<36x384xbf16>, vector<8x384xf32> -> vector<8x384xf32>
    %30 = arith.truncf %29 : vector<8x384xf32> to vector<8x384xbf16>
    %c0_42 = arith.constant 0 : index
    %c0_43 = arith.constant 0 : index
    %c0_44 = arith.constant 0 : index
    %31 = vector.load %arg5[%c0_42, %c0_43, %c0_44] : memref<1x8x384xbf16, #tpu.memory_space<vmem>>, vector<1x8x384xbf16>
    %32 = vector.shape_cast %31 : vector<1x8x384xbf16> to vector<8x384xbf16>
    %33 = vector.shape_cast %30 : vector<8x384xbf16> to vector<1x8x384xbf16>
    tpu.vector_store %arg5[%c0_42, %c0_43, %c0_44], %33 {strides = array<i32>} : memref<1x8x384xbf16, #tpu.memory_space<vmem>>, vector<1x8x384xbf16>,
    %c0_45 = arith.constant 0 : index
    %c0_46 = arith.constant 0 : index
    %34 = vector.load %arg4[%c0_45, %c0_46] : memref<1x384xf32, #tpu.memory_space<vmem>>, vector<1x384xf32>
    %35 = vector.broadcast %34 : vector<1x384xf32> to vector<8x384xf32>
    %36 = arith.mulf %29, %35 : vector<8x384xf32>
    %cst_47 = arith.constant dense<0.000000e+00> : vector<8xf32>
    %37 = vector.multi_reduction <add>, %36, %cst_47 [1] : vector<8x384xf32> to vector<8xf32>
    %38 = vector.shape_cast %37 : vector<8xf32> to vector<8x1xf32>
    %39 = arith.mulf %36, %29 : vector<8x384xf32>
    %cst_48 = arith.constant dense<0.000000e+00> : vector<8xf32>
    %40 = vector.multi_reduction <add>, %39, %cst_48 [1] : vector<8x384xf32> to vector<8xf32>
    %41 = vector.shape_cast %40 : vector<8xf32> to vector<8x1xf32>
    %c0_i32 = arith.constant 0 : i32
    %42 = arith.cmpi eq, %arg1, %c0_i32 : i32
    %43 = arith.extui %42 : i1 to i32
    %c0_i32_49 = arith.constant 0 : i32
    %44 = arith.cmpi ne, %43, %c0_i32_49 : i32
    scf.if %44 {
      %cst_56 = arith.constant 0.000000e+00 : f32
      %52 = vector.broadcast %cst_56 : f32 to vector<1x8x2xf32>
      %c0_57 = arith.constant 0 : index
      %c0_58 = arith.constant 0 : index
      %c0_59 = arith.constant 0 : index
      %53 = vector.load %arg6[%c0_57, %c0_58, %c0_59] : memref<1x8x2xf32, #tpu.memory_space<vmem>>, vector<1x8x2xf32>
      tpu.vector_store %arg6[%c0_57, %c0_58, %c0_59], %52 {strides = array<i32>} : memref<1x8x2xf32, #tpu.memory_space<vmem>>, vector<1x8x2xf32>,
    } else {
    }
    %c0_50 = arith.constant 0 : index
    %c0_51 = arith.constant 0 : index
    %c0_52 = arith.constant 0 : index
    %45 = vector.load %arg6[%c0_50, %c0_51, %c0_52] : memref<1x8x2xf32, #tpu.memory_space<vmem>>, vector<1x8x2xf32>
    %46 = vector.shape_cast %45 : vector<1x8x2xf32> to vector<8x2xf32>
    %47 = tpu.concatenate %38, %41 in 1 : vector<8x1xf32>, vector<8x1xf32> -> vector<8x2xf32>
    %48 = arith.addf %46, %47 : vector<8x2xf32>
    %c0_53 = arith.constant 0 : index
    %c0_54 = arith.constant 0 : index
    %c0_55 = arith.constant 0 : index
    %49 = vector.load %arg6[%c0_53, %c0_54, %c0_55] : memref<1x8x2xf32, #tpu.memory_space<vmem>>, vector<1x8x2xf32>
    %50 = vector.shape_cast %49 : vector<1x8x2xf32> to vector<8x2xf32>
    %51 = vector.shape_cast %48 : vector<8x2xf32> to vector<1x8x2xf32>
    tpu.vector_store %arg6[%c0_53, %c0_54, %c0_55], %51 {strides = array<i32>} : memref<1x8x2xf32, #tpu.memory_space<vmem>>, vector<1x8x2xf32>,
    return
  }
  func.func @transform_0(%arg0: i32, %arg1: i32) -> (i32, i32, i32, i32) {
    %c0_i32 = arith.constant 0 : i32
    %c0_i32_0 = arith.constant 0 : i32
    %c0_i32_1 = arith.constant 0 : i32
    return %arg0, %arg1, %c0_i32, %c0_i32_0 : i32, i32, i32, i32
  }
  func.func @transform_1(%arg0: i32, %arg1: i32) -> (i32, i32) {
    %c0_i32 = arith.constant 0 : i32
    %c0_i32_0 = arith.constant 0 : i32
    %c0_i32_1 = arith.constant 0 : i32
    return %c0_i32, %c0_i32_0 : i32, i32
  }
  func.func @transform_2(%arg0: i32, %arg1: i32) -> (i32, i32) {
    %c0_i32 = arith.constant 0 : i32
    %c0_i32_0 = arith.constant 0 : i32
    return %c0_i32, %arg1 : i32, i32
  }
  func.func @transform_3(%arg0: i32, %arg1: i32) -> (i32, i32, i32) {
    %c0_i32 = arith.constant 0 : i32
    %c0_i32_0 = arith.constant 0 : i32
    return %arg0, %c0_i32, %arg1 : i32, i32, i32
  }
  func.func @transform_4(%arg0: i32, %arg1: i32) -> (i32, i32, i32) {
    %c0_i32 = arith.constant 0 : i32
    %c0_i32_0 = arith.constant 0 : i32
    %c0_i32_1 = arith.constant 0 : i32
    return %arg0, %c0_i32, %c0_i32_0 : i32, i32, i32
  }
}

module attributes {stable_mosaic.version = 11 : i64} {
  func.func @_bn_apply_kernel(%arg0: i32, %arg1: i32, %arg2: memref<1x8x384xbf16, #tpu.memory_space<vmem>>, %arg3: memref<8x1xf32, #tpu.memory_space<vmem>>, %arg4: memref<8x1xf32, #tpu.memory_space<vmem>>, %arg5: memref<1x8x384xf32, #tpu.memory_space<vmem>>) attributes {dimension_semantics = [#tpu.dimension_semantics<parallel>, #tpu.dimension_semantics<parallel>], iteration_bounds = array<i64: 2, 1>, scalar_prefetch = 0 : i64, scratch_operands = 0 : i64, tpu.core_type = #tpu.core_type<tc>, window_params = [{transform_indices = @transform_0, window_bounds = array<i64: 1, 8, 384>}, {pipeline_mode = #tpu.pipeline_mode<synchronous>, transform_indices = @transform_1, window_bounds = array<i64: 8, 1>}, {pipeline_mode = #tpu.pipeline_mode<synchronous>, transform_indices = @transform_2, window_bounds = array<i64: 8, 1>}, {transform_indices = @transform_3, window_bounds = array<i64: 1, 8, 384>}]} {
    %c0 = arith.constant 0 : index
    %c0_0 = arith.constant 0 : index
    %c0_1 = arith.constant 0 : index
    %0 = vector.load %arg2[%c0, %c0_0, %c0_1] : memref<1x8x384xbf16, #tpu.memory_space<vmem>>, vector<1x8x384xbf16>
    %1 = vector.shape_cast %0 : vector<1x8x384xbf16> to vector<8x384xbf16>
    %2 = arith.extf %1 : vector<8x384xbf16> to vector<8x384xf32>
    %c0_2 = arith.constant 0 : index
    %c0_3 = arith.constant 0 : index
    %3 = vector.load %arg3[%c0_2, %c0_3] : memref<8x1xf32, #tpu.memory_space<vmem>>, vector<8x1xf32>
    %4 = vector.broadcast %3 : vector<8x1xf32> to vector<8x384xf32>
    %5 = arith.mulf %2, %4 : vector<8x384xf32>
    %c0_4 = arith.constant 0 : index
    %c0_5 = arith.constant 0 : index
    %6 = vector.load %arg4[%c0_4, %c0_5] : memref<8x1xf32, #tpu.memory_space<vmem>>, vector<8x1xf32>
    %7 = vector.broadcast %6 : vector<8x1xf32> to vector<8x384xf32>
    %8 = arith.addf %5, %7 : vector<8x384xf32>
    %c0_6 = arith.constant 0 : index
    %c0_7 = arith.constant 0 : index
    %c0_8 = arith.constant 0 : index
    %9 = vector.load %arg5[%c0_6, %c0_7, %c0_8] : memref<1x8x384xf32, #tpu.memory_space<vmem>>, vector<1x8x384xf32>
    %10 = vector.shape_cast %9 : vector<1x8x384xf32> to vector<8x384xf32>
    %11 = vector.shape_cast %8 : vector<8x384xf32> to vector<1x8x384xf32>
    tpu.vector_store %arg5[%c0_6, %c0_7, %c0_8], %11 {strides = array<i32>} : memref<1x8x384xf32, #tpu.memory_space<vmem>>, vector<1x8x384xf32>,
    return
  }
  func.func @transform_0(%arg0: i32, %arg1: i32) -> (i32, i32, i32) {
    %c0_i32 = arith.constant 0 : i32
    %c0_i32_0 = arith.constant 0 : i32
    return %arg0, %c0_i32, %arg1 : i32, i32, i32
  }
  func.func @transform_1(%arg0: i32, %arg1: i32) -> (i32, i32) {
    %c0_i32 = arith.constant 0 : i32
    %c0_i32_0 = arith.constant 0 : i32
    %c0_i32_1 = arith.constant 0 : i32
    return %c0_i32, %c0_i32_0 : i32, i32
  }
  func.func @transform_2(%arg0: i32, %arg1: i32) -> (i32, i32) {
    %c0_i32 = arith.constant 0 : i32
    %c0_i32_0 = arith.constant 0 : i32
    %c0_i32_1 = arith.constant 0 : i32
    return %c0_i32, %c0_i32_0 : i32, i32
  }
  func.func @transform_3(%arg0: i32, %arg1: i32) -> (i32, i32, i32) {
    %c0_i32 = arith.constant 0 : i32
    %c0_i32_0 = arith.constant 0 : i32
    return %arg0, %c0_i32, %arg1 : i32, i32, i32
  }
}

</mosaic_0001>

<bundles_post_ra>
// kernel: conv2d_bn_forward.3
= control target key start
LH: loop header
LB: loop body
LE: loop exit
PB: predicated region body
PF: predicated region fallthrough
CT: control target
= control target key end

     0   :  { %s405_s12 = smov 0   ;;  %s407_s13 = smov 0   ;;  %s444_s0 = inlined_call_operand.vmem [shape: bf16[2,8,384], index: 0, kind: input, shape index: {}]   ;;  %s445_s1 = inlined_call_operand.vmem [shape: f32[8,1], index: 1, kind: input, shape index: {}]   ;;  %s446_s2 = inlined_call_operand.vmem [shape: f32[8,1], index: 2, kind: input, shape index: {}]   ;;  %s447_s3 = inlined_call_operand.vmem [shape: f32[2,8,384], index: 3, kind: output, shape index: {}]  }
   0x1   :  { %s409_s14 = smov 0  }
   0x2 LB: > { %s25_s15 = sadd.s32 1, %s378_s13  ;;  %p327_p0 = scmp.ge.s32.totalorder %s382_s14, 1  ;;  %s382_s14 = sphi %s409_s14, %s13_s14   ;;  %s378_s13 = sphi %s407_s13, %s449_s13   ;;  %s374_s12 = sphi %s405_s12, %s448_s12  }
   0x3   : > { %p27_p1 = scmp.ge.s32.totalorder %s25_s15, 2  ;;  %p158_p2 = scmp.lt.s32.totalorder %s382_s14, 3 }
   0x5   : > { %s451_s15 = smov (%p27_p1, %s25_s15), 0  ;;  %p159_p3 = pnand %p327_p0, %p158_p2 }
   0x6   : > { %p191_p4 = scmp.lt.s32.totalorder (!%p159_p3), %s374_s12, 1 }
   0x7   : > { %162 = sbr.rel (%p159_p3) target bundleno = 142 (0x8e), region = 32 }
   0xc   : > { %v215_v0 = vld [vmem:[%s445_s1] sm:$0xff]  ;;  %v384_v1 = vmov 0   ;;  %s453_s12 = smov (!%p191_p4, %s374_s12), 1 }
   0xd   : > { %359 = vset.pattern.permute.xlu0 %v384_v1  ;;  %v224_v2 = vld [vmem:[%s446_s2] sm:$0xff]  ;;  %s332_s20 = smul.u32 12, %s453_s12 }
   0xe   : > { %218 = vperm.xlu0 %359, %v215_v0   ;;  %s333_s24 = smul.u32 24, %s453_s12 }
   0xf   : > { %s198_s23 = scalar_lea.vmem %s444_s0, %s332_s20 }
  0x10   : > { %v210_v4 = vld [vmem:[%s198_s23] sm:$0xff]  ;;  %v211_v5 = vld [vmem:[%s198_s23 + $0x8] sm:$0xf]  ;;  %s208_s27 = scalar_lea.vmem %s447_s3, %s333_s24 }
  0x11   : > { %v212_v6 = vunpack.c.l.bf16 %v210_v4  ;;  %v213_v7 = vunpack.c.h.bf16 %v210_v4  ;;  %v214_v8 = vunpack.c.l.bf16 %v211_v5 }
  0x16   : > { %227 = vperm.xlu0 %359, %v224_v2  }
  0x80   : > { %v219_v3 = vpop.permute.xlu0 %218 }
  0x81   : > { %v221_v9 = vmul.f32 %v219_v3, %v212_v6  ;;  %v222_v10 = vmul.f32 %v219_v3, %v213_v7  ;;  %v223_v11 = vmul.f32 %v219_v3, %v214_v8 }
  0x88   : > { %v228_v12 = vpop.permute.xlu0 %227 }
  0x89   : > { %v230_v13 = vadd.f32 %v228_v12, %v221_v9  ;;  %v231_v14 = vadd.f32 %v228_v12, %v222_v10  ;;  %v232_v15 = vadd.f32 %v228_v12, %v223_v11 }
  0x8b   : > { %233 = vst [vmem:[%s208_s27] sm:$0xff] %v230_v13 }
  0x8c   : > { %234 = vst [vmem:[%s208_s27 + $0x8] sm:$0xff] %v231_v14 }
  0x8d   : > { %235 = vst [vmem:[%s208_s27 + $0x10] sm:$0xff] %v232_v15 }
  0x8e PF: > { %s13_s14 = sadd.s32 1, %s382_s14   ;;  %s448_s12 = smov %s378_s13 }
  0x8f   : > { %p10_p5 = scmp.ge.s32.totalorder %s13_s14, 4   ;;  %s449_s13 = smov %s451_s15 }
  0x91   :  { %12 = sbr.rel (!%p10_p5) target bundleno = 2 (0x2), region = 62 }

// kernel: conv2d_bn_forward.2
= control target key start
LH: loop header
LB: loop body
LE: loop exit
PB: predicated region body
PF: predicated region fallthrough
CT: control target
= control target key end

     0   :  { %s861_s15 = smov 0   ;;  %s863_s16 = smov 0   ;;  %s934_s0 = inlined_call_operand.vmem [shape: bf16[2,1,4,512], index: 0, kind: input, shape index: {}]   ;;  %s935_s1 = inlined_call_operand.vmem [shape: bf16[8,36], index: 1, kind: input, shape index: {}]   ;;  %s936_s2 = inlined_call_operand.vmem [shape: f32[1,384], index: 2, kind: input, shape index: {}]   ;;  %s937_s3 = inlined_call_operand.vmem [shape: bf16[2,8,384], index: 3, kind: output, shape index: {0}]   ;;  %s938_s4 = inlined_call_operand.vmem [shape: f32[2,8,2], index: 4, kind: output, shape index: {1}]  }
   0x1   :  { %s865_s17 = smov 0  }
   0x2 LB: > { %s27_s18 = sadd.s32 1, %s821_s16  ;;  %p728_p0 = scmp.ge.s32.totalorder %s825_s17, 1  ;;  %s825_s17 = sphi %s865_s17, %s15_s17   ;;  %s821_s16 = sphi %s863_s16, %s940_s16   ;;  %s817_s15 = sphi %s861_s15, %s939_s15  }
   0x3   : > { %p29_p1 = scmp.ge.s32.totalorder %s27_s18, 2  ;;  %p195_p2 = scmp.lt.s32.totalorder %s825_s17, 3 }
   0x5   : > { %s942_s18 = smov (%p29_p1, %s27_s18), 0  ;;  %p196_p3 = pnand %p728_p0, %p195_p2 }
   0x6   : > { %p237_p4 = scmp.lt.s32.totalorder (!%p196_p3), %s817_s15, 1  ;;  %s827_s23 = smov (!%p196_p3), 127  }
   0x7   : > { %199 = sbr.rel (%p196_p3) target bundleno = 498 (0x1f2), region = 32  ;;  %s828_s24 = smov (!%p196_p3), 126  }
   0x8   : > { %s829_s25 = smov (!%p196_p3), 109   ;;  %s830_s26 = smov (!%p196_p3), 108  }
   0x9   : > { %s831_s27 = smov (!%p196_p3), 92   ;;  %s832_s28 = smov (!%p196_p3), 91  }
   0xa   : > { %s833_s29 = smov (!%p196_p3), 90   ;;  %s834_s30 = smov (!%p196_p3), 110  }
   0xc   : > { %s944_s15 = smov (!%p237_p4, %s817_s15), 1  ;;  %vm312_vm0 = vcmask 1031168   ;;  %vm291_vm1 = vcmask 1039360   ;;  %vm398_vm2 = vcmask 752640   ;;  %vm289_vm3 = vcmask 1043456  }
   0xd   : > { %s762_s19 = sshll.u32 %s944_s15, 3  ;;  %vm355_vm4 = vcmask 891904   ;;  %vm377_vm5 = vcmask 883712   ;;  %vm420_vm6 = vcmask 744448   ;;  %vm441_vm7 = vcmask 736256   ;;  %s769_s9 = smul.u32 12, %s944_s15 }
   0xe   : > { %s245_s22 = scalar_lea.vmem %s934_s0, %s762_s19  ;;  %vm503_vm8 = vcmask 1041408   ;;  %vm334_vm9 = vcmask 900096   ;;  %vm499_vm10 = vcmask 293888   ;;  %s264_s20 = scalar_lea.vmem %s938_s4, %s762_s19  ;;  %vm582_vm11 = vcmask 15360  }
   0xf   : > { %v266_v0 = vld [vmem:[%s245_s22] sm:$0x3f]  ;;  %s259_s12 = scalar_lea.vmem %s937_s3, %s769_s9  ;;  %vm585_vm12 = vcmask 7168  }
  0x10   : > { %268 = vst [vmem:[#allocation1] ss:$2 sm:$0xff] %v266_v0  ;;  %v275_v1 = vld [vmem:[%s245_s22] sm:$0xff] }
  0x17   : > { %v269_v2 = vld.sshfl [vmem:[#allocation1] sm:$0xff pattern:$0x75643120]  ;;  %v270_v3 = vld.sshfl [vmem:[#allocation1 + $0x8] sm:$0xff pattern:$0x75643120] }
  0x18   : > { %278 = vst [vmem:[#allocation1 + $0x1] ss:$2 sm:$0xff] %v275_v1 }
  0x19   : > { %273 = vst [vmem:[#allocation2] sm:$0x33] %v269_v2 }
  0x1a   : > { %274 = vst [vmem:[#allocation2 + $0x8] sm:$0x3] %v270_v3 }
  0x1f   : > { %v281_v4 = vld.sshfl [vmem:[#allocation1 + $0x8] sm:$0xff pattern:$0x75643120]  ;;  %v279_v5 = vld.sshfl [vmem:[#allocation1] sm:$0xff pattern:$0x75643120] }
  0x20   : > { %285 = vrot.lane.b32.xlu1 %v281_v4, %s827_s23  ;;  %300 = vst [vmem:[#allocation1] ss:$2 sm:$0xff] %v275_v1 }
  0x27   : > { %v301_v6 = vld.sshfl [vmem:[#allocation1] sm:$0xff pattern:$0x75643120]  ;;  %v303_v7 = vld.sshfl [vmem:[#allocation1 + $0x8] sm:$0xff pattern:$0x75643120] }
  0x28   : > { %322 = vst [vmem:[#allocation1 + $0x1] ss:$2 sm:$0xff] %v275_v1  ;;  %307 = vrot.lane.b32.xlu2 %v303_v7, %s828_s24 }
  0x2f   : > { %v323_v8 = vld.sshfl [vmem:[#allocation1] sm:$0xff pattern:$0x75643120]  ;;  %v325_v9 = vld.sshfl [vmem:[#allocation1 + $0x8] sm:$0xff pattern:$0x75643120] }
  0x30   : > { %343 = vst [vmem:[#allocation1] ss:$2 sm:$0xff] %v275_v1 }
  0x37   : > { %v346_v10 = vld.sshfl [vmem:[#allocation1 + $0x8] sm:$0xff pattern:$0x75643120]  ;;  %v344_v11 = vld.sshfl [vmem:[#allocation1] sm:$0xff pattern:$0x75643120] }
  0x38   : > { %350 = vrot.lane.b32.xlu1 %v346_v10, %s829_s25  ;;  %365 = vst [vmem:[#allocation1 + $0x1] ss:$2 sm:$0xff] %v275_v1  ;;  %348 = vrot.lane.b32.xlu0 %v344_v11, %s829_s25 }
  0x3f   : > { %v368_v12 = vld.sshfl [vmem:[#allocation1 + $0x8] sm:$0xff pattern:$0x75643120]  ;;  %v366_v13 = vld.sshfl [vmem:[#allocation1] sm:$0xff pattern:$0x75643120] }
  0x40   : > { %372 = vrot.lane.b32.xlu1 %v368_v12, %s830_s26  ;;  %386 = vst [vmem:[#allocation1] ss:$2 sm:$0xff] %v275_v1 }
  0x47   : > { %v389_v14 = vld.sshfl [vmem:[#allocation1 + $0x8] sm:$0xff pattern:$0x75643120]  ;;  %v387_v15 = vld.sshfl [vmem:[#allocation1] sm:$0xff pattern:$0x75643120] }
  0x48   : > { %370 = vrot.lane.b32.xlu1 %v366_v13, %s830_s26  ;;  %393 = vrot.lane.b32.xlu2 %v389_v14, %s831_s27  ;;  %408 = vst [vmem:[#allocation1 + $0x1] ss:$2 sm:$0xff] %v275_v1 }
  0x4f   : > { %v409_v16 = vld.sshfl [vmem:[#allocation1] sm:$0xff pattern:$0x75643120]  ;;  %v411_v17 = vld.sshfl [vmem:[#allocation1 + $0x8] sm:$0xff pattern:$0x75643120] }
  0x50   : > { %283 = vrot.lane.b32.xlu1 %v279_v5, %s827_s23  ;;  %413 = vrot.lane.b32.xlu0 %v409_v16, %s832_s28  ;;  %429 = vst [vmem:[#allocation1] ss:$2 sm:$0xff] %v275_v1 }
  0x51   : > { %391 = vrot.lane.b32.xlu2 %v387_v15, %s831_s27 }
  0x57   : > { %v432_v18 = vld.sshfl [vmem:[#allocation1 + $0x8] sm:$0xff pattern:$0x75643120]  ;;  %v430_v19 = vld.sshfl [vmem:[#allocation1] sm:$0xff pattern:$0x75643120] }
  0x58   : > { %436 = vrot.lane.b32.xlu0 %v432_v18, %s833_s29 }
  0x59   : > { %415 = vrot.lane.b32.xlu2 %v411_v17, %s832_s28 }
  0x60   : > { %434 = vrot.lane.b32.xlu0 %v430_v19, %s833_s29 }
  0x61   : > { %305 = vrot.lane.b32.xlu2 %v301_v6, %s828_s24 }
  0x68   : > { %329 = vrot.lane.b32.xlu0 %v325_v9, %s834_s30 }
  0x70   : > { %327 = vrot.lane.b32.xlu0 %v323_v8, %s834_s30 }
  0x82   : > { %v308_v20 = vpop.permute.xlu2 %307 }
  0x83   : > { %v310_v21 = vrot.slane %v308_v20, 4 }
  0x85   : > { %v314_v22 = vsel %vm312_vm0, %v308_v20, %v310_v21 }
  0x86   : > { %318 = vst [vmem:[#allocation2 + $0x14] sm:$0x3] %v314_v22 }
  0x92   : > { %v286_v23 = vpop.permute.xlu1 %285 }
  0x93   : > { %v288_v24 = vrot.slane %v286_v23, 4 }
  0x95   : > { %v293_v25 = vsel %vm291_vm1, %v286_v23, %v288_v24 }
  0x96   : > { %297 = vst [vmem:[#allocation2 + $0x8] sm:$0xc] %v293_v25 }
  0xa2   : > { %v394_v26 = vpop.permute.xlu2 %393 }
  0xa3   : > { %v396_v27 = vrot.slane %v394_v26, 4 }
  0xa5   : > { %v400_v28 = vsel %vm398_vm2, %v394_v26, %v396_v27  ;;  %v743_v26 = vld [vmem:[#allocation2 + $0x8] sm:$0xf] }
  0xa6   : > { %404 = vst [vmem:[#allocation2 + $0x2c] sm:$0x3] %v400_v28 }
  0xaa   : > { %v351_v29 = vpop.permute.xlu1 %350  ;;  %v349_v30 = vpop.permute.xlu0 %348 }
  0xab   : > { %v353_v31 = vrot.slane %v351_v29, 4  ;;  %v392_v32 = vpop.permute.xlu2 %391  ;;  %v352_v33 = vrot.slane %v349_v30, 4 }
  0xac   : > { %v395_v34 = vrot.slane %v392_v32, 4 }
  0xad   : > { %v357_v35 = vsel %vm355_vm4, %v351_v29, %v353_v31  ;;  %v354_v36 = vsel %vm289_vm3, %v352_v33, %v353_v31 }
  0xae   : > { %361 = vst [vmem:[#allocation2 + $0x20] sm:$0x3] %v357_v35  ;;  %v397_v37 = vsel %vm289_vm3, %v395_v34, %v396_v27  ;;  %v356_v38 = vsel %vm355_vm4, %v349_v30, %v354_v36  ;;  %v448_v35 = vld [vmem:[%s935_s1] sm:$0xf] }
  0xaf   : > { %v399_v39 = vsel %vm398_vm2, %v392_v32, %v397_v37  ;;  %360 = vst [vmem:[#allocation2 + $0x18] sm:$0x33] %v356_v38 }
  0xb0   : > { %403 = vst [vmem:[#allocation2 + $0x24] sm:$0x33] %v399_v39 }
  0xb2   : > { %v373_v40 = vpop.permute.xlu1 %372 }
  0xb3   : > { %v375_v41 = vrot.slane %v373_v40, 4  ;;  %v416_v42 = vpop.permute.xlu2 %415 }
  0xb4   : > { %v418_v43 = vrot.slane %v416_v42, 4 }
  0xb5   : > { %v379_v44 = vsel %vm377_vm5, %v373_v40, %v375_v41 }
  0xb6   : > { %383 = vst [vmem:[#allocation2 + $0x20] sm:$0xc] %v379_v44  ;;  %v422_v45 = vsel %vm420_vm6, %v416_v42, %v418_v43  ;;  %v556_v42 = vld [vmem:[%s936_s2] sm:$0x7] }
  0xb7   : > { %426 = vst [vmem:[#allocation2 + $0x2c] sm:$0xc] %v422_v45  ;;  %v559_v44 = vperm.slane %v556_v42, 1  ;;  %v560_v45 = vperm.slane %v556_v42, 2 }
  0xba   : > { %v371_v46 = vpop.permute.xlu1 %370 }
  0xbb   : > { %v374_v47 = vrot.slane %v371_v46, 4  ;;  %v306_v48 = vpop.permute.xlu2 %305 }
  0xbc   : > { %v309_v49 = vrot.slane %v306_v48, 4 }
  0xbd   : > { %v376_v50 = vsel %vm289_vm3, %v374_v47, %v375_v41  ;;  %v755_v10 = vld [vmem:[#allocation2 + $0x20] sm:$0xf] }
  0xbe   : > { %v378_v51 = vsel %vm377_vm5, %v371_v46, %v376_v50  ;;  %v311_v52 = vsel %vm289_vm3, %v309_v49, %v310_v21  ;;  %v768_v11 = vld [vmem:[#allocation2 + $0x28] sm:$0xf0] }
  0xbf   : > { %382 = vst [vmem:[#allocation2 + $0x18] sm:$0xcc] %v378_v51  ;;  %v313_v53 = vsel %vm312_vm0, %v306_v48, %v311_v52  ;;  %v756_v14 = vor.u32 %v768_v11, %v755_v10 }
  0xc0   : > { %317 = vst [vmem:[#allocation2 + $0xc] sm:$0x33] %v313_v53 }
  0xc2   : > { %v284_v54 = vpop.permute.xlu1 %283  ;;  %v414_v55 = vpop.permute.xlu0 %413 }
  0xc3   : > { %v287_v56 = vrot.slane %v284_v54, 4  ;;  %v417_v57 = vrot.slane %v414_v55, 4 }
  0xc5   : > { %v290_v58 = vsel %vm289_vm3, %v287_v56, %v288_v24  ;;  %v419_v59 = vsel %vm289_vm3, %v417_v57, %v418_v43  ;;  %v558_v43 = vperm.slane %v556_v42, 0 }
  0xc6   : > { %v292_v60 = vsel %vm291_vm1, %v284_v54, %v290_v58  ;;  %v421_v61 = vsel %vm420_vm6, %v414_v55, %v419_v59  ;;  %v747_v28 = vld [vmem:[#allocation2 + $0x18] sm:$0xf]  ;;  %v766_v29 = vld [vmem:[#allocation2 + $0x1c] sm:$0xf] }
  0xc7   : > { %296 = vst [vmem:[#allocation2] sm:$0xcc] %v292_v60 }
  0xc8   : > { %425 = vst [vmem:[#allocation2 + $0x24] sm:$0xcc] %v421_v61 }
  0xca   : > { %v437_v62 = vpop.permute.xlu0 %436 }
  0xcb   : > { %v439_v63 = vrot.slane %v437_v62, 4 }
  0xcd   : > { %v443_v0 = vsel %vm441_vm7, %v437_v62, %v439_v63 }
  0xce   : > { %447 = vst [vmem:[#allocation2 + $0x38] sm:$0x3] %v443_v0  ;;  %v735_v36 = vld [vmem:[#allocation2] sm:$0xf]  ;;  %v763_v38 = vld [vmem:[#allocation2 + $0x4] sm:$0xf] }
  0xcf   : > { %v767_v21 = vld [vmem:[#allocation2 + $0x20] sm:$0xf0]  ;;  %v749_v25 = vld [vmem:[#allocation2 + $0x24] sm:$0xf0]  ;;  %v835_v0 = vmov 0.0  }
  0xd0   : > { %v748_v32 = vor.u32 %v767_v21, %v747_v28  ;;  %v752_v33 = vor.u32 %v766_v29, %v749_v25  ;;  %583 = vst.msk [vmem:[%s264_s20] sm:$0xff] %vm582_vm11, %v835_v0 }
  0xd2   : > { %v435_v1 = vpop.permute.xlu0 %434 }
  0xd3   : > { %v438_v2 = vrot.slane %v435_v1, 4 }
  0xd5   : > { %v440_v3 = vsel %vm289_vm3, %v438_v2, %v439_v63  ;;  %v458_v4 = vld [vmem:[#allocation2 + $0x38] sm:$0x3] }
  0xd6   : > { %v442_v5 = vsel %vm441_vm7, %v435_v1, %v440_v3  ;;  %v483_v6 = vunpack.c.l.b16 %v458_v4 }
  0xd7   : > { %446 = vst [vmem:[#allocation2 + $0x30] sm:$0x33] %v442_v5  ;;  %v584_v1 = vld [vmem:[%s264_s20] sm:$0xff] }
  0xd8   : > { %v492_v7 = vpack.c.b16 %v483_v6, %v483_v6 }
  0xda   : > { %v330_v8 = vpop.permute.xlu0 %329  ;;  %v511_v9 = vsel %vm503_vm8, %v492_v7, 0 }
  0xdb   : > { %v332_v12 = vrot.slane %v330_v8, 4  ;;  %544 = vmatpush.bf16.msra.mxu2 %v511_v9 }
  0xdd   : > { %v336_v13 = vsel %vm334_vm9, %v330_v8, %v332_v12 }
  0xde   : > { %340 = vst [vmem:[#allocation2 + $0x14] sm:$0xc] %v336_v13  ;;  %v457_v15 = vld [vmem:[#allocation2 + $0x30] sm:$0x33] }
  0xdf   : > { %545 = vmatpush.bf16.msra.mxu2 %v756_v14  ;;  %v481_v16 = vunpack.c.l.b16 %v457_v15  ;;  %v482_v17 = vunpack.c.h.b16 %v457_v15 }
  0xe1   : > { %v490_v18 = vpack.c.b16 %v481_v16, %v481_v16  ;;  %v491_v19 = vpack.c.b16 %v482_v17, %v482_v17 }
  0xe2   : > { %v328_v20 = vpop.permute.xlu0 %327 }
  0xe3   : > { %v331_v22 = vrot.slane %v328_v20, 4  ;;  %v505_v23 = vsel %vm503_vm8, %v490_v18, 0  ;;  %v508_v24 = vsel %vm503_vm8, %v491_v19, 0 }
  0xe4   : > { %518 = vmatpush.bf16.msra.mxu0 %v505_v23  ;;  %531 = vmatpush.bf16.msra.mxu1 %v508_v24 }
  0xe5   : > { %v333_v27 = vsel %vm289_vm3, %v331_v22, %v332_v12  ;;  %v765_v30 = vld [vmem:[#allocation2 + $0x10] sm:$0xf0] }
  0xe6   : > { %v335_v31 = vsel %vm334_vm9, %v328_v20, %v333_v27  ;;  %v744_v34 = vor.u32 %v765_v30, %v743_v26 }
  0xe7   : > { %339 = vst [vmem:[#allocation2 + $0xc] sm:$0xcc] %v335_v31 }
  0xe8   : > { %519 = vmatpush.bf16.msra.mxu0 %v748_v32  ;;  %532 = vmatpush.bf16.msra.mxu1 %v752_v33 }
  0xe9   : > { %546 = vmatpush.bf16.msra.mxu2 %v744_v34 }
  0xec   : > { %759 = vmatmul.msk.bf16.vlgmr.msra.gmra.mxu2 %vm499_vm10, %v448_v35 }
  0xee   : > { %v764_v37 = vld [vmem:[#allocation2 + $0x8] sm:$0xf0]  ;;  %v737_v39 = vld [vmem:[#allocation2 + $0xc] sm:$0xf0] }
  0xef   : > { %v736_v40 = vor.u32 %v764_v37, %v735_v36  ;;  %v740_v41 = vor.u32 %v763_v38, %v737_v39 }
  0xf1   : > { %520 = vmatpush.bf16.msra.mxu0 %v736_v40  ;;  %533 = vmatpush.bf16.msra.mxu1 %v740_v41 }
  0xf4   : > { %757 = vmatmul.msk.bf16.vlgmr.msra.gmra.mxu0 %vm499_vm10, %v448_v35  ;;  %758 = vmatmul.msk.bf16.vlgmr.msra.gmra.mxu1 %vm499_vm10, %v448_v35 }
 0x16f   : > { %v548_v46 = vpop.f32.mrf.mxu2 }
 0x170   : > { %v553_v47 = vpack.c.bf16 %v548_v46, %v548_v46  ;;  %v566_v53 = vmul.f32 %v560_v45, %v548_v46 }
 0x171   : > { %v522_v48 = vpop.f32.mrf.mxu0  ;;  %v535_v49 = vpop.f32.mrf.mxu1 }
 0x172   : > { %555 = vst [vmem:[%s259_s12 + $0x8] sm:$0xf] %v553_v47  ;;  %v564_v50 = vmul.f32 %v558_v43, %v522_v48  ;;  %v552_v51 = vpack.c.bf16 %v535_v49, %v522_v48  ;;  %v565_v52 = vmul.f32 %v559_v44, %v535_v49  ;;  %v573_v58 = vmul.f32 %v566_v53, %v548_v46 }
 0x174   : > { %v571_v54 = vmul.f32 %v564_v50, %v522_v48  ;;  %554 = vst [vmem:[%s259_s12] sm:$0xff] %v552_v51  ;;  %v572_v55 = vmul.f32 %v565_v52, %v535_v49  ;;  %v567_v56 = vadd.f32 %v565_v52, %v564_v50 }
 0x176   : > { %v568_v57 = vadd.f32 %v567_v56, %v566_v53  ;;  %v574_v59 = vadd.f32 %v572_v55, %v571_v54 }
 0x177   : > { %v550_v60 = vpop.f32.mrf.mxu2 }
 0x178   : > { %569 = vadd.xlane.f32.xlu1 %v568_v57  ;;  %v575_v61 = vadd.f32 %v574_v59, %v573_v58 }
 0x179   : > { %v524_v62 = vpop.f32.mrf.mxu0  ;;  %v537_v63 = vpop.f32.mrf.mxu1 }
 0x17a   : > { %576 = vadd.xlane.f32.xlu2 %v575_v61 }
 0x1eb   : > { %v570_v2 = vpop.xlane.xlu1 %569 }
 0x1ed   : > { %v577_v3 = vpop.xlane.xlu2 %576 }
 0x1ee   : > { %v586_v4 = vsel %vm585_vm12, %v570_v2, %v577_v3 }
 0x1ef   : > { %v587_v5 = vadd.f32 %v586_v4, %v584_v1 }
 0x1f1   : > { %589 = vst.msk [vmem:[%s264_s20] sm:$0xff] %vm582_vm11, %v587_v5 }
 0x1f2 PF: > { %s15_s17 = sadd.s32 1, %s825_s17   ;;  %s939_s15 = smov %s821_s16 }
 0x1f3   : > { %p12_p5 = scmp.ge.s32.totalorder %s15_s17, 4   ;;  %s940_s16 = smov %s942_s18 }
 0x1f5   :  { %14 = sbr.rel (!%p12_p5) target bundleno = 2 (0x2), region = 85 }

</bundles_post_ra>
